<compile_context>
chip_gen: v7x
topology: tpu7x:2x2x1
jax: 0.10.0
libtpu: 0.0.40
codegen_flags: <defaults>
</compile_context>

<pallas_src>
import jax
import jax.numpy as jnp
from jax.experimental import pallas as pl
from jax.experimental.pallas import tpu as pltpu


_MXU_N = 256  # MXU-native feature-tile granularity on v6e/v7x (multiple of v5e's 128)


def _round_up(x, m):
    return ((x + m - 1) // m) * m


def select_tiling(out_features, batch, in_features,
                  vmem_budget_bytes=40 * 1024 * 1024):
    """Pick (tn, f_pad) for the feature axis.

    tn is a multiple of 256 (lane-dense output stores, fills the 256-wide MXU).
    Prefers <=2 grid steps: a single tile for small layers (no pipeline overhead),
    two balanced super-tiles for wider layers so the "parallel" grid axis can use
    both TensorCores on v7x.  Shrinks tn if the estimated VMEM footprint exceeds a
    budget that leaves headroom on v7x's 64 MiB VMEM (v5e/v6e have 128 MiB and could
    go larger, but this budget is already big enough for DeepSurv-sized layers).
    """
    f_min = _round_up(out_features, _MXU_N)
    if f_min <= _MXU_N:
        tn = f_min
    else:
        tn = _round_up(-(-f_min // 2), _MXU_N)  # ~half the layer, keeps >=2 steps (v7x)

    def footprint(t):
        f32 = 4
        return (2 * in_features * t * f32      # weight double-buffer
                + 2 * batch * t * f32          # output double-buffer
                + batch * in_features * f32    # resident x block
                + 2 * batch * t * f32          # in-kernel f32 temporaries (y, diff)
                + 2 * 8 * t * f32)             # packed params (padded to 8 sublanes), x2 buffers

    while tn > _MXU_N and footprint(tn) > vmem_budget_bytes:
        tn = _round_up(tn // 2, _MXU_N)

    grid = -(-out_features // tn)
    f_pad = grid * tn
    return tn, f_pad


def prepare_params(weight, bias, gamma, beta, f_pad):
    """One-time (outside the hot path) feature-axis padding + packing of affine params.

    Returns (weight_padded [F_in, f_pad], params_packed [3, f_pad]) where the packed
    rows are (bias, gamma, beta).  Padding values MUST stay zero (see note above).
    """
    f_out = weight.shape[1]
    pad = f_pad - f_out
    if pad:
        weight = jnp.pad(weight, ((0, 0), (0, pad)))
        bias = jnp.pad(bias, ((0, 0), (0, pad)))
        gamma = jnp.pad(gamma, ((0, 0), (0, pad)))
        beta = jnp.pad(beta, ((0, 0), (0, pad)))
    params = jnp.concatenate([bias, gamma, beta], axis=0)  # (3, f_pad)
    return weight, params


def block_kernel(x_ref, w_ref, p_ref, o_ref):
    # Linear: x @ W  (MXU matmul in the operands' native dtype, f32 accumulation)
    y = jnp.dot(x_ref[...], w_ref[...], preferred_element_type=jnp.float32)

    # Packed affine params: rows 0/1/2 = bias / gamma / beta, each (1, tn).
    p = p_ref[...].astype(jnp.float32)
    bias, gamma, beta = p[0:1, :], p[1:2, :], p[2:3, :]

    # + bias, ReLU
    y = jnp.maximum(y + bias, 0.0)

    # BatchNorm1d (training mode: batch mean, biased variance, eps=1e-5).
    # Two-pass (diff-based) variance for numerical safety; epilogue stays f32.
    inv_n = 1.0 / y.shape[0]
    mean = jnp.sum(y, axis=0, keepdims=True) * inv_n            # (1, tn)
    diff = y - mean
    var = jnp.sum(diff * diff, axis=0, keepdims=True) * inv_n   # (1, tn)

    # Per-feature scale row (rsqrt lands on the EUP slot), then one FMA over the tile.
    scale = gamma * jax.lax.rsqrt(var + 1e-5)
    o_ref[...] = (diff * scale + beta).astype(o_ref.dtype)


def block_forward(x, weight_p, params_p, tn, *, out_features=None):
    """x: [B, F_in]; weight_p: [F_in, f_pad]; params_p: [3, f_pad] (bias/gamma/beta).

    tn: feature-tile width from select_tiling (multiple of 256, divides f_pad).
    out_features: if given and < f_pad, the padded lanes are sliced off (extra copy);
                  pass None when downstream code can consume the padded width.
    """
    B, F_in = x.shape
    f_pad = weight_p.shape[1]
    assert f_pad % tn == 0
    grid = f_pad // tn

    out = pl.pallas_call(
        block_kernel,
        out_shape=jax.ShapeDtypeStruct((B, f_pad), x.dtype),
        grid_spec=pltpu.PrefetchScalarGridSpec(
            num_scalar_prefetch=0,
            grid=(grid,),
            in_specs=[
                pl.BlockSpec((B, F_in), lambda j: (0, 0)),    # x: resident, reused per tile
                pl.BlockSpec((F_in, tn), lambda j: (0, j)),   # weight: tiled along features
                pl.BlockSpec((3, tn), lambda j: (0, j)),      # packed bias/gamma/beta
            ],
            out_specs=pl.BlockSpec((B, tn), lambda j: (0, j)),
        ),
        compiler_params=pltpu.CompilerParams(
            dimension_semantics=("parallel",),   # independent feature tiles -> 2 TCs on v7x
            vmem_limit_bytes=48 * 1024 * 1024,   # headroom-safe on v7x's 64 MiB VMEM
        ),
    )(x, weight_p, params_p)

    if out_features is not None and out_features != f_pad:
        out = out[:, :out_features]
    return out


def init_params(key, in_features, out_features):
    kw, kb = jax.random.split(key)
    # kaiming_normal_(nonlinearity='relu'): std = sqrt(2 / fan_in), fan_in = in_features
    std = (2.0 / in_features) ** 0.5
    weight = std * jax.random.normal(kw, (in_features, out_features), jnp.float32)
    # torch Linear default bias init: U(-1/sqrt(fan_in), 1/sqrt(fan_in))
    bound = 1.0 / (in_features ** 0.5)
    bias = jax.random.uniform(kb, (1, out_features), jnp.float32, -bound, bound)
    # BatchNorm1d affine params at init
    gamma = jnp.ones((1, out_features), jnp.float32)
    beta = jnp.zeros((1, out_features), jnp.float32)
    return weight, bias, gamma, beta


def _reference(x, weight, bias, gamma, beta):
    y = jnp.maximum(x @ weight + bias, 0.0)
    mu = jnp.mean(y, axis=0, keepdims=True)
    var = jnp.mean((y - mu) ** 2, axis=0, keepdims=True)
    return (y - mu) / jnp.sqrt(var + 1e-5) * gamma + beta


if __name__ == "__main__":
    key = jax.random.PRNGKey(0)
    k_x, k_p1, k_p2 = jax.random.split(key, 3)

    batch, in_features = 8, 32
    x = jax.random.normal(k_x, (batch, in_features), jnp.float32)

    # Case 1: small DeepSurv hidden block (F_out=200) -> single 256-wide tile, grid=1.
    f1 = 200
    w1, b1, g1, bt1 = init_params(k_p1, in_features, f1)
    tn1, fp1 = select_tiling(f1, batch, in_features)
    w1p, p1p = prepare_params(w1, b1, g1, bt1, fp1)   # padded/packed ONCE, not per call
    out1 = block_forward(x, w1p, p1p, tn1, out_features=f1)
    jax.block_until_ready(out1)
    assert out1.shape == (batch, f1)
    assert jnp.allclose(out1, _reference(x, w1, b1, g1, bt1), atol=1e-4, rtol=1e-4)

    # Case 2: wider block (F_out=600) -> two 512-wide super-tiles, grid=2
    # (exercises the multi-step / megacore path and the padded feature lanes).
    f2 = 600
    w2, b2, g2, bt2 = init_params(k_p2, in_features, f2)
    tn2, fp2 = select_tiling(f2, batch, in_features)
    w2p, p2p = prepare_params(w2, b2, g2, bt2, fp2)
    out2 = block_forward(x, w2p, p2p, tn2, out_features=f2)
    jax.block_until_ready(out2)
    assert out2.shape == (batch, f2)
    assert jnp.allclose(out2, _reference(x, w2, b2, g2, bt2), atol=1e-4, rtol=1e-4)

    print("KERNEL_OK")
</pallas_src>

<mosaic_0001>
module attributes {stable_mosaic.version = 11 : i64} {
  func.func @block_kernel(%arg0: i32, %arg1: memref<8x32xf32, #tpu.memory_space<vmem>>, %arg2: memref<32x256xf32, #tpu.memory_space<vmem>>, %arg3: memref<3x256xf32, #tpu.memory_space<vmem>>, %arg4: memref<8x256xf32, #tpu.memory_space<vmem>>) attributes {dimension_semantics = [#tpu.dimension_semantics<parallel>], iteration_bounds = array<i64: 1>, scalar_prefetch = 0 : i64, scratch_operands = 0 : i64, tpu.core_type = #tpu.core_type<tc>, window_params = [{pipeline_mode = #tpu.pipeline_mode<synchronous>, transform_indices = @transform_0, window_bounds = array<i64: 8, 32>}, {transform_indices = @transform_1, window_bounds = array<i64: 32, 256>}, {transform_indices = @transform_2, window_bounds = array<i64: 3, 256>}, {transform_indices = @transform_3, window_bounds = array<i64: 8, 256>}]} {
    %c0 = arith.constant 0 : index
    %c0_0 = arith.constant 0 : index
    %0 = vector.load %arg1[%c0, %c0_0] : memref<8x32xf32, #tpu.memory_space<vmem>>, vector<8x32xf32>
    %c0_1 = arith.constant 0 : index
    %c0_2 = arith.constant 0 : index
    %1 = vector.load %arg2[%c0_1, %c0_2] : memref<32x256xf32, #tpu.memory_space<vmem>>, vector<32x256xf32>
    %cst = arith.constant dense<0.000000e+00> : vector<8x256xf32>
    %2 = tpu.matmul %0, %1, %cst {dimension_numbers = #tpu.dot_dimension_numbers<[1], [0], [0], [1], [0, 0, 1, 1], [], []>} : vector<8x32xf32>, vector<32x256xf32>, vector<8x256xf32> -> vector<8x256xf32>
    %c0_3 = arith.constant 0 : index
    %c0_4 = arith.constant 0 : index
    %3 = vector.load %arg3[%c0_3, %c0_4] : memref<3x256xf32, #tpu.memory_space<vmem>>, vector<3x256xf32>
    %4 = vector.extract_strided_slice %3 {offsets = [0, 0], sizes = [1, 256], strides = [1, 1]} : vector<3x256xf32> to vector<1x256xf32>
    %5 = vector.extract_strided_slice %3 {offsets = [1, 0], sizes = [1, 256], strides = [1, 1]} : vector<3x256xf32> to vector<1x256xf32>
    %6 = vector.extract_strided_slice %3 {offsets = [2, 0], sizes = [1, 256], strides = [1, 1]} : vector<3x256xf32> to vector<1x256xf32>
    %7 = vector.broadcast %4 : vector<1x256xf32> to vector<8x256xf32>
    %8 = arith.addf %2, %7 : vector<8x256xf32>
    %cst_5 = arith.constant 0.000000e+00 : f32
    %9 = vector.broadcast %cst_5 : f32 to vector<8x256xf32>
    %10 = arith.maximumf %8, %9 : vector<8x256xf32>
    %cst_6 = arith.constant dense<0.000000e+00> : vector<256xf32>
    %11 = vector.multi_reduction <add>, %10, %cst_6 [0] : vector<8x256xf32> to vector<256xf32>
    %12 = vector.shape_cast %11 : vector<256xf32> to vector<1x256xf32>
    %cst_7 = arith.constant 1.250000e-01 : f32
    %13 = vector.broadcast %cst_7 : f32 to vector<1x256xf32>
    %14 = arith.mulf %12, %13 : vector<1x256xf32>
    %15 = vector.broadcast %14 : vector<1x256xf32> to vector<8x256xf32>
    %16 = arith.subf %10, %15 : vector<8x256xf32>
    %17 = arith.mulf %16, %16 : vector<8x256xf32>
    %cst_8 = arith.constant dense<0.000000e+00> : vector<256xf32>
    %18 = vector.multi_reduction <add>, %17, %cst_8 [0] : vector<8x256xf32> to vector<256xf32>
    %19 = vector.shape_cast %18 : vector<256xf32> to vector<1x256xf32>
    %cst_9 = arith.constant 1.250000e-01 : f32
    %20 = vector.broadcast %cst_9 : f32 to vector<1x256xf32>
    %21 = arith.mulf %19, %20 : vector<1x256xf32>
    %cst_10 = arith.constant 9.99999974E-6 : f32
    %22 = vector.broadcast %cst_10 : f32 to vector<1x256xf32>
    %23 = arith.addf %21, %22 : vector<1x256xf32>
    %24 = math.rsqrt %23 : vector<1x256xf32>
    %25 = arith.mulf %5, %24 : vector<1x256xf32>
    %26 = vector.broadcast %25 : vector<1x256xf32> to vector<8x256xf32>
    %27 = arith.mulf %16, %26 : vector<8x256xf32>
    %28 = vector.broadcast %6 : vector<1x256xf32> to vector<8x256xf32>
    %29 = arith.addf %27, %28 : vector<8x256xf32>
    %c0_11 = arith.constant 0 : index
    %c0_12 = arith.constant 0 : index
    %30 = vector.load %arg4[%c0_11, %c0_12] : memref<8x256xf32, #tpu.memory_space<vmem>>, vector<8x256xf32>
    tpu.vector_store %arg4[%c0_11, %c0_12], %29 {strides = array<i32>} : memref<8x256xf32, #tpu.memory_space<vmem>>, vector<8x256xf32>,
    return
  }
  func.func @transform_0(%arg0: i32) -> (i32, i32) {
    %c0_i32 = arith.constant 0 : i32
    %c0_i32_0 = arith.constant 0 : i32
    %c0_i32_1 = arith.constant 0 : i32
    return %c0_i32, %c0_i32_0 : i32, i32
  }
  func.func @transform_1(%arg0: i32) -> (i32, i32) {
    %c0_i32 = arith.constant 0 : i32
    %c0_i32_0 = arith.constant 0 : i32
    return %c0_i32, %arg0 : i32, i32
  }
  func.func @transform_2(%arg0: i32) -> (i32, i32) {
    %c0_i32 = arith.constant 0 : i32
    %c0_i32_0 = arith.constant 0 : i32
    return %c0_i32, %arg0 : i32, i32
  }
  func.func @transform_3(%arg0: i32) -> (i32, i32) {
    %c0_i32 = arith.constant 0 : i32
    %c0_i32_0 = arith.constant 0 : i32
    return %c0_i32, %arg0 : i32, i32
  }
}

</mosaic_0001>

<bundles_post_ra>
// kernel: tpu_custom_call.1
= control target key start
LH: loop header
LB: loop body
LE: loop exit
PB: predicated region body
PF: predicated region fallthrough
CT: control target
= control target key end

     0   :  { %8 = vsyncpa [#allocation3], 0  ;;  %s463_s0 = inlined_call_operand.hbm [shape: f32[8,32], index: 0, kind: input, shape index: {}]   ;;  %s464_s1 = inlined_call_operand.hbm [shape: f32[32,256], index: 1, kind: input, shape index: {}]   ;;  %s465_s2 = inlined_call_operand.hbm [shape: f32[3,256], index: 2, kind: input, shape index: {}]   ;;  %s466_s3 = inlined_call_operand.hbm [shape: f32[8,256], index: 3, kind: output, shape index: {}]  }
   0x1   :  { %9 = vsyncpa [#allocation6], 0 }
   0x2   :  { %10 = vsyncpa [#allocation4], 0  ;;  %s373_s12 = smov [#allocation5]   ;;  %s279_s16 = scalar_lea.hbm %s464_s1, 1024 }
   0x3   :  { %s26_s13 = sshll.u32 %s373_s12, 4  ;;  %p280_p0 = scmp.ne.s32.totalorder %s464_s1, %s279_s16  ;;  %s27_s13 = int_to_ptr.vmem [resolvable:$true] %s26_s13 }
   0x4   :  { %p283_p1 = scmp.lt.u32.totalorder %s279_s16, %s464_s1 }
   0x6   :  { %p285_p2 = pnand %p283_p1, %p280_p0 }
   0x8   :  { %288 = shalt.err (!%p285_p2)
}
   0x9   :  { %s289_s21 = scalar_lea.vmem %s27_s13, 1024  ;;  %p294_p4 = scmp.lt.s32.totalorder %s27_s13, %s27_s13 }
   0xa   :  { %p290_p3 = scmp.ne.s32.totalorder %s27_s13, %s289_s21  ;;  %p295_p5 = scmp.lt.s32.totalorder %s289_s21, %s289_s21 }
   0xc   :  { %p296_p6 = por %p295_p5, %p294_p4 }
   0xe   :  { %p297_p7 = pnand %p296_p6, %p290_p3 }
  0x10   :  { %300 = shalt.err (!%p297_p7)
}
  0x11   :  { %s374_s22 = smov 256   ;;  %s375_s23 = smov 16  }
  0x12   :  { %32 = dma.hbm_to_vmem [thread:$0]  %s464_s1, 1024, %s27_s13, [#allocation6], %s374_s22, %s374_s22, %s375_s23  }
  0x13   :  { %s376_s26 = smov [#allocation2]   ;;  %s377_s28 = smov [#allocation7]  }
  0x14   :  { %s17_s27 = sshll.u32 %s376_s26, 4  ;;  %s39_s29 = sshll.u32 %s377_s28, 4  ;;  %s18_s27 = int_to_ptr.vmem [resolvable:$true] %s17_s27  ;;  %s40_s29 = int_to_ptr.vmem [resolvable:$true] %s39_s29 }
  0x15   :  { %s301_s5 = scalar_lea.hbm %s463_s0, 128 }
  0x16   :  { %p302_p8 = scmp.ne.s32.totalorder %s463_s0, %s301_s5  ;;  %p305_p9 = scmp.lt.u32.totalorder %s301_s5, %s463_s0 }
  0x18   :  { %p307_p10 = pnand %p305_p9, %p302_p8 }
  0x1a   :  { %310 = shalt.err (!%p307_p10)
}
  0x1b   :  { %s311_s1 = scalar_lea.vmem %s18_s27, 128  ;;  %p316_p12 = scmp.lt.s32.totalorder %s18_s27, %s18_s27 }
  0x1c   :  { %p312_p11 = scmp.ne.s32.totalorder %s18_s27, %s311_s1  ;;  %p317_p13 = scmp.lt.s32.totalorder %s311_s1, %s311_s1 }
  0x1e   :  { %p318_p0 = por %p317_p13, %p316_p12 }
  0x20   :  { %p319_p1 = pnand %p318_p0, %p312_p11 }
  0x22   :  { %322 = shalt.err (!%p319_p1)
}
  0x23   :  { %20 = dma.hbm_to_vmem [thread:$0]  %s463_s0, 128, %s18_s27, [#allocation3]  }
  0x24   :  { %s323_s14 = scalar_lea.hbm %s465_s2, 128 }
  0x25   :  { %p324_p2 = scmp.ne.s32.totalorder %s465_s2, %s323_s14  ;;  %p327_p3 = scmp.lt.u32.totalorder %s323_s14, %s465_s2 }
  0x27   :  { %p329_p4 = pnand %p327_p3, %p324_p2 }
  0x29   :  { %332 = shalt.err (!%p329_p4)
}
  0x2a   :  { %s333_s19 = scalar_lea.vmem %s40_s29, 128  ;;  %p338_p6 = scmp.lt.s32.totalorder %s40_s29, %s40_s29 }
  0x2b   :  { %p334_p5 = scmp.ne.s32.totalorder %s40_s29, %s333_s19  ;;  %p339_p7 = scmp.lt.s32.totalorder %s333_s19, %s333_s19 }
  0x2d   :  { %p340_p8 = por %p339_p7, %p338_p6 }
  0x2f   :  { %p341_p9 = pnand %p340_p8, %p334_p5 }
  0x31   :  { %344 = shalt.err (!%p341_p9)
}
  0x32   :  { %42 = dma.hbm_to_vmem [thread:$0]  %s465_s2, 128, %s40_s29, [#allocation6]  }
  0x33   :  { %367 = dma.done.wait [#allocation3], 128  }
  0x34   :  { %368 = vsyncadd [#allocation3], 4294967168 }
  0x35   :  { %369 = dma.done.wait [#allocation6], 1152  }
  0x36   :  { %370 = vsyncadd [#allocation6], 4294966144  ;;  %v378_v0 = vmov 0.0   ;;  %v54_v1 = vld [vmem:[#allocation5 + $0x8] sm:$0xff]  ;;  %v56_v2 = vld [vmem:[#allocation5 + $0x18] sm:$0xff]  ;;  %vm81_vm0 = vcmask 261120   ;;  %v63_v14 = vlaneseq }
  0x37   :  { %149 = vmatprep.mubr.f32.mxu0 %v378_v0  ;;  %v53_v3 = vld [vmem:[#allocation5] sm:$0xff]  ;;  %v260_v4 = vpack.c.bf16 %v56_v2, %v54_v1  ;;  %v55_v5 = vld [vmem:[#allocation5 + $0x10] sm:$0xff]  ;;  %v58_v6 = vld [vmem:[#allocation5 + $0x28] sm:$0xff]  ;;  %s379_s2 = smov [#allocation8]  }
  0x38   :  { %v60_v7 = vld [vmem:[#allocation5 + $0x38] sm:$0xff]  ;;  %v262_v8 = vpack.c.bf16 %v55_v5, %v53_v3  ;;  %v57_v10 = vld [vmem:[#allocation5 + $0x20] sm:$0xff]  ;;  %v59_v11 = vld [vmem:[#allocation5 + $0x30] sm:$0xff]  ;;  %v436_v15 = vshrl.u32 %v63_v14, 7  ;;  %s249_s21 = sshll.u32 %s379_s2, 4  ;;  %s250_s21 = int_to_ptr.vmem [resolvable:$true] %s249_s21 }
  0x39   :  { %v264_v9 = vpack.c.bf16 %v60_v7, %v58_v6  ;;  %261 = vmatprep.subr.bf16.mxu0 %v260_v4  ;;  %v266_v12 = vpack.c.bf16 %v59_v11, %v57_v10  ;;  %v52_v13 = vld [vmem:[#allocation2] sm:$0xff]  ;;  %v439_v17 = vld [vmem:[#allocation7] sm:$0x77]  ;;  %s345_s22 = scalar_lea.vmem %s250_s21, 256  ;;  %p350_p11 = scmp.lt.s32.totalorder %s250_s21, %s250_s21 }
  0x3a   :  { %263 = vmatpush1.bf16.msra.mxu0 %v262_v8  ;;  %v65_v16 = vsub.s32 0, %v436_v15  ;;  %v69_v18 = vsub.s32 4, %v436_v15  ;;  %v223_v2 = vsub.s32 2, %v436_v15  ;;  %v227_v3 = vsub.s32 6, %v436_v15  ;;  %p346_p10 = scmp.ne.s32.totalorder %s250_s21, %s345_s22  ;;  %p351_p12 = scmp.lt.s32.totalorder %s345_s22, %s345_s22 }
  0x3b   :  { %265 = vmatprep.subr.bf16.mxu0 %v264_v9  ;;  %v203_v5 = vsub.s32 1, %v436_v15  ;;  %v207_v6 = vsub.s32 5, %v436_v15 }
  0x3c   :  { %v66_v19 = vrot.slane %v439_v17, %v65_v16  ;;  %v70_v20 = vrot.slane %v439_v17, %v69_v18  ;;  %v224_v8 = vrot.slane %v439_v17, %v223_v2  ;;  %v228_v9 = vrot.slane %v439_v17, %v227_v3  ;;  %p352_p13 = por %p351_p12, %p350_p11 }
  0x3e   :  { %267 = vmatpush1.bf16.msra.mxu0 %v266_v12  ;;  %v76_v21 = vrot.slane %v66_v19, %v65_v16  ;;  %v80_v22 = vrot.slane %v70_v20, %v65_v16  ;;  %v234_v14 = vrot.slane %v224_v8, %v223_v2  ;;  %v238_v16 = vrot.slane %v228_v9, %v223_v2  ;;  %p353_p0 = pnand %p352_p13, %p346_p10 }
  0x41   :  { %259 = vmatmul.mubr.msk.f32.vlgmr.msra.gmra.mrb[0].mxu0 %vm81_vm0, %v52_v13 }
 0x114   :  { %v151_v23 = vpop.f32.mrb[0].mxu0 }
 0x115   :  { %v152_v24 = vadd.f32 %v151_v23, %v76_v21  ;;  %v153_v25 = vpop.f32.mrb[1].mxu0 }
 0x116   :  { %v154_v26 = vadd.f32 %v153_v25, %v80_v22 }
 0x117   :  { %v156_v27 = vmax.f32 %v152_v24, 0.0 }
 0x118   :  { %v157_v28 = vmax.f32 %v154_v26, 0.0 }
 0x119   :  { %v158_v29 = vrot.slane %v156_v27, 4 }
 0x11a   :  { %v164_v30 = vrot.slane %v157_v28, 4 }
 0x11b   :  { %v159_v31 = vadd.f32 %v158_v29, %v156_v27 }
 0x11c   :  { %v165_v32 = vadd.f32 %v164_v30, %v157_v28 }
 0x11d   :  { %v160_v33 = vrot.slane %v159_v31, 2 }
 0x11e   :  { %v166_v34 = vrot.slane %v165_v32, 2 }
 0x11f   :  { %v161_v35 = vadd.f32 %v160_v33, %v159_v31 }
 0x120   :  { %v167_v36 = vadd.f32 %v166_v34, %v165_v32 }
 0x121   :  { %v162_v37 = vrot.slane %v161_v35, 1 }
 0x122   :  { %v168_v38 = vrot.slane %v167_v36, 1 }
 0x123   :  { %v163_v39 = vadd.f32 %v162_v37, %v161_v35 }
 0x124   :  { %v169_v40 = vadd.f32 %v168_v38, %v167_v36 }
 0x125   :  { %v170_v41 = vmul.f32 0.125, %v163_v39 }
 0x126   :  { %v171_v42 = vmul.f32 0.125, %v169_v40 }
 0x127   :  { %v172_v43 = vsub.f32 %v156_v27, %v170_v41 }
 0x128   :  { %v173_v44 = vsub.f32 %v157_v28, %v171_v42 }
 0x129   :  { %v174_v45 = vmul.f32 %v172_v43, %v172_v43 }
 0x12a   :  { %v175_v46 = vmul.f32 %v173_v44, %v173_v44 }
 0x12b   :  { %v176_v47 = vrot.slane %v174_v45, 4 }
 0x12c   :  { %v182_v48 = vrot.slane %v175_v46, 4 }
 0x12d   :  { %v177_v49 = vadd.f32 %v176_v47, %v174_v45 }
 0x12e   :  { %v183_v50 = vadd.f32 %v182_v48, %v175_v46 }
 0x12f   :  { %v178_v51 = vrot.slane %v177_v49, 2 }
 0x130   :  { %v184_v52 = vrot.slane %v183_v50, 2 }
 0x131   :  { %v179_v53 = vadd.f32 %v178_v51, %v177_v49 }
 0x132   :  { %v185_v54 = vadd.f32 %v184_v52, %v183_v50 }
 0x133   :  { %v180_v55 = vrot.slane %v179_v53, 1 }
 0x134   :  { %v186_v56 = vrot.slane %v185_v54, 1 }
 0x135   :  { %v181_v57 = vadd.f32 %v180_v55, %v179_v53 }
 0x136   :  { %v187_v58 = vadd.f32 %v186_v56, %v185_v54 }
 0x137   :  { %v188_v59 = vmul.f32 0.125, %v181_v57 }
 0x138   :  { %v189_v60 = vmul.f32 0.125, %v187_v58 }
 0x139   :  { %v190_v61 = vadd.f32 1e-05, %v188_v59 }
 0x13a   :  { %v191_v62 = vadd.f32 1e-05, %v189_v60 }
 0x13b   :  { %275 = vrsqrt.f32 %v190_v61 }
 0x13c   :  { %277 = vrsqrt.f32 %v191_v62 }
 0x145   :  { %v276_v63 = vpop.eup %275 }
 0x146   :  { %v278_v0 = vpop.eup %277 }
 0x147   :  { %v196_v1 = vcombine.low %v276_v63, %v278_v0 }
 0x149   :  { %v197_v4 = vrot.slane %v196_v1, 7 }
 0x14b   :  { %v199_v7 = vmul.f32 %v197_v4, %v439_v17 }
 0x14d   :  { %v204_v10 = vrot.slane %v199_v7, %v203_v5  ;;  %v208_v11 = vrot.slane %v199_v7, %v207_v6 }
 0x14f   :  { %v214_v12 = vrot.slane %v204_v10, %v203_v5  ;;  %v218_v13 = vrot.slane %v208_v11, %v203_v5 }
 0x151   :  { %v219_v18 = vmul.f32 %v214_v12, %v172_v43  ;;  %v220_v19 = vmul.f32 %v218_v13, %v173_v44 }
 0x153   :  { %v239_v20 = vadd.f32 %v234_v14, %v219_v18  ;;  %v240_v21 = vadd.f32 %v238_v16, %v220_v19 }
 0x155   :  { %241 = vst [vmem:[#allocation8] sm:$0xff] %v239_v20  ;;  %242 = vst [vmem:[#allocation8 + $0x8] sm:$0xff] %v240_v21 }
 0x156   :  { %356 = shalt.err (!%p353_p0)
}
 0x157   :  { %s357_s25 = scalar_lea.hbm %s466_s3, 256 }
 0x158   :  { %p358_p1 = scmp.ne.s32.totalorder %s466_s3, %s357_s25  ;;  %p361_p2 = scmp.lt.u32.totalorder %s357_s25, %s466_s3 }
 0x15a   :  { %p363_p3 = pnand %p361_p2, %p358_p1 }
 0x15c   :  { %366 = shalt.err (!%p363_p3)
}
 0x15d   :  { %252 = dma.vmem_to_hbm [thread:$0]  %s250_s21, 256, %s466_s3, [#allocation4]  }
 0x15e   :  { %371 = dma.done.wait [#allocation4], 256  }
 0x15f   :  { %372 = vsyncadd [#allocation4], 4294967040 }
 0x160   :  { %256 = vsyncpa [#allocation3], 1 }
 0x161   :  { %257 = vsyncpa [#allocation6], 1 }
 0x162   :  { %258 = vsyncpa [#allocation4], 1 }

</bundles_post_ra>
